<compile_context>
chip_gen: v7x
topology: tpu7x:2x2x1
jax: 0.10.0
libtpu: 0.0.40
codegen_flags: <defaults>
</compile_context>

<pallas_src>
import functools

import jax
import jax.numpy as jnp
from jax.experimental import pallas as pl
from jax.experimental.pallas import tpu as pltpu


def _round_up(v, m):
    return -(-v // m) * m


# ----------------------------------------------------------------------------
# Fused Pallas kernel: conv1x1 + SiLU -> conv1x1 + SiLU -> (+ residual)
# ----------------------------------------------------------------------------

def _ecb_kernel(x_ref, w1_ref, b1_ref, w2_ref, b2_ref, o_ref, *, use_residual):
    # x_ref: (1, Cin, TM) -- channels on sublanes, pixels on lanes (lane-dense)
    x = x_ref[0]                                           # (Cin, TM), io dtype
    xb = x.astype(jnp.bfloat16)                            # bf16 MXU operand

    # reduce: h = SiLU(W1 @ x + b1)   (f32 accumulate + f32 epilogue)
    h = jnp.dot(w1_ref[...], xb, preferred_element_type=jnp.float32)
    h = h + b1_ref[...]                                    # (Ch, TM) f32
    h = h * jax.nn.sigmoid(h)                              # SiLU

    # expand: y = SiLU(W2 @ h + b2)
    y = jnp.dot(w2_ref[...], h.astype(jnp.bfloat16),
                preferred_element_type=jnp.float32)
    y = y + b2_ref[...]                                    # (Cout, TM) f32
    y = y * jax.nn.sigmoid(y)                              # SiLU

    if use_residual:
        y = y + x.astype(jnp.float32)                      # Cout == Cin

    o_ref[0] = y.astype(o_ref.dtype)


def ecb_forward(x_nchw, params, *, use_residual=True,
                vmem_tile_budget_bytes=4 << 20):
    """EnhancedConvolutionalBlock forward.

    x_nchw: (N, C1, H, W), any float dtype (bf16 recommended; output matches)
    params: dict with BN-folded weights:
        w1: (Ch, C1), b1: (Ch,), w2: (C2, Ch), b2: (C2,)
    """
    N, C1, H, W = x_nchw.shape
    Ch = params['w1'].shape[0]
    C2 = params['w2'].shape[0]
    if use_residual:
        assert C2 == C1, "residual requires output_channels == input_channels"

    M = H * W
    x2 = x_nchw.reshape(N, C1, M)      # NCHW is already (C, pixels): zero-copy

    io_bytes = jnp.dtype(x_nchw.dtype).itemsize

    # VMEM-budget-driven pixel tile (multiple of 128, capped at 2048):
    #   double-buffered x/out tiles + f32 h/y intermediates per lane.
    per_lane_bytes = 2 * C1 * io_bytes + 2 * C2 * io_bytes + 4 * (Ch + C2 + C1)
    tm_budget = max(128, (vmem_tile_budget_bytes // per_lane_bytes) // 128 * 128)
    tm_budget = min(tm_budget, 2048)
    if M <= 128:
        TM = M                                 # block == full dim (no masking)
    else:
        TM = min(tm_budget, _round_up(M, 128))
    grid = (N, pl.cdiv(M, TM))                 # ragged last block handled by Pallas

    # Resident weights in bf16 (tiny), biases in f32 as (C, 1) columns.
    w1 = params['w1'].astype(jnp.bfloat16)
    w2 = params['w2'].astype(jnp.bfloat16)
    b1 = params['b1'].astype(jnp.float32).reshape(Ch, 1)
    b2 = params['b2'].astype(jnp.float32).reshape(C2, 1)

    cost = pl.CostEstimate(
        flops=2 * N * M * (C1 * Ch + Ch * C2),
        transcendentals=N * M * (Ch + C2),
        bytes_accessed=N * M * (C1 + C2) * io_bytes
        + 2 * (w1.size + w2.size) + 4 * (Ch + C2),
    )

    out = pl.pallas_call(
        functools.partial(_ecb_kernel, use_residual=use_residual),
        out_shape=jax.ShapeDtypeStruct((N, C2, M), x_nchw.dtype),
        grid=grid,
        in_specs=[
            pl.BlockSpec((1, C1, TM), lambda n, m: (n, 0, m)),
            pl.BlockSpec((Ch, C1), lambda n, m: (0, 0)),
            pl.BlockSpec((Ch, 1), lambda n, m: (0, 0)),
            pl.BlockSpec((C2, Ch), lambda n, m: (0, 0)),
            pl.BlockSpec((C2, 1), lambda n, m: (0, 0)),
        ],
        out_specs=pl.BlockSpec((1, C2, TM), lambda n, m: (n, 0, m)),
        compiler_params=pltpu.CompilerParams(
            dimension_semantics=("parallel", "parallel"),
            vmem_limit_bytes=32 * 1024 * 1024),
        cost_estimate=cost,
    )(x2, w1, b1, w2, b2)

    return out.reshape(N, C2, H, W)


# ----------------------------------------------------------------------------
# Deterministic synthetic parameters (Conv2d 1x1, no bias, + folded BN)
# ----------------------------------------------------------------------------

def init_params(key, input_channels, hidden_channels, output_channels):
    ks = jax.random.split(key, 4)

    def conv_w(k, cout, cin, s=0.25):
        return jax.random.normal(k, (cout, cin), jnp.float32) * s

    def bn_stats(k, c):
        k1, k2, k3, k4 = jax.random.split(k, 4)
        gamma = 1.0 + 0.1 * jax.random.normal(k1, (c,), jnp.float32)
        beta = 0.1 * jax.random.normal(k2, (c,), jnp.float32)
        mean = 0.1 * jax.random.normal(k3, (c,), jnp.float32)
        var = 0.5 + jax.random.uniform(k4, (c,), jnp.float32)
        return gamma, beta, mean, var

    def fold_conv_bn(w, stats, eps=1e-5):
        gamma, beta, mean, var = stats
        s = gamma * jax.lax.rsqrt(var + eps)
        return w * s[:, None], beta - mean * s

    p = {}
    p['w1'], p['b1'] = fold_conv_bn(
        conv_w(ks[0], hidden_channels, input_channels),
        bn_stats(ks[1], hidden_channels))
    p['w2'], p['b2'] = fold_conv_bn(
        conv_w(ks[2], output_channels, hidden_channels),
        bn_stats(ks[3], output_channels))
    return p


# ----------------------------------------------------------------------------
# Pure-JAX f32 reference (for correctness check)
# ----------------------------------------------------------------------------

def ecb_reference(x_nchw, params, *, use_residual=True):
    N, C1, H, W = x_nchw.shape
    x2 = x_nchw.reshape(N, C1, H * W).astype(jnp.float32)
    h = jnp.einsum('oc,ncm->nom', params['w1'], x2) + params['b1'][None, :, None]
    h = h * jax.nn.sigmoid(h)
    y = jnp.einsum('oc,ncm->nom', params['w2'], h) + params['b2'][None, :, None]
    y = y * jax.nn.sigmoid(y)
    if use_residual:
        y = y + x2
    return y.reshape(N, -1, H, W)


if __name__ == "__main__":
    key = jax.random.PRNGKey(0)
    # Small shapes consistent with the module: batch=2, channels=4, spatial=16,
    # hidden=32 (output defaults to input_channels so the residual applies).
    N, C1, H, W = 2, 4, 16, 16
    hidden, C2 = 32, 4

    kx, kp = jax.random.split(key)
    x_f32 = jax.random.normal(kx, (N, C1, H, W), jnp.float32)
    x = x_f32.astype(jnp.bfloat16)   # bf16 activations: half the HBM traffic
    params = init_params(kp, C1, hidden, C2)
    # TODO(synk): nn.Dropout is identity here (rate=0.0 / inference mode); no
    # stochastic dropout is implemented.

    out = jax.jit(functools.partial(ecb_forward, use_residual=True))(x, params)
    out = jax.block_until_ready(out)

    ref = ecb_reference(x.astype(jnp.float32), params, use_residual=True)

    assert out.shape == (N, C2, H, W), out.shape
    out_f32 = out.astype(jnp.float32)
    assert bool(jnp.all(jnp.isfinite(out_f32)))
    max_err = float(jnp.max(jnp.abs(out_f32 - ref)))
    assert bool(jnp.allclose(out_f32, ref, rtol=3e-2, atol=3e-2)), max_err
    print("KERNEL_OK")
</pallas_src>

<mosaic_0001>
module attributes {stable_mosaic.version = 11 : i64} {
  func.func @_ecb_kernel(%arg0: i32, %arg1: i32, %arg2: memref<1x4x256xbf16, #tpu.memory_space<vmem>>, %arg3: memref<32x4xbf16, #tpu.memory_space<vmem>>, %arg4: memref<32x1xf32, #tpu.memory_space<vmem>>, %arg5: memref<4x32xbf16, #tpu.memory_space<vmem>>, %arg6: memref<4x1xf32, #tpu.memory_space<vmem>>, %arg7: memref<1x4x256xbf16, #tpu.memory_space<vmem>>) attributes {dimension_semantics = [#tpu.dimension_semantics<parallel>, #tpu.dimension_semantics<parallel>], iteration_bounds = array<i64: 2, 1>, scalar_prefetch = 0 : i64, scratch_operands = 0 : i64, tpu.core_type = #tpu.core_type<tc>, window_params = [{transform_indices = @transform_0, window_bounds = array<i64: 1, 4, 256>}, {pipeline_mode = #tpu.pipeline_mode<synchronous>, transform_indices = @transform_1, window_bounds = array<i64: 32, 4>}, {pipeline_mode = #tpu.pipeline_mode<synchronous>, transform_indices = @transform_2, window_bounds = array<i64: 32, 1>}, {pipeline_mode = #tpu.pipeline_mode<synchronous>, transform_indices = @transform_3, window_bounds = array<i64: 4, 32>}, {pipeline_mode = #tpu.pipeline_mode<synchronous>, transform_indices = @transform_4, window_bounds = array<i64: 4, 1>}, {transform_indices = @transform_5, window_bounds = array<i64: 1, 4, 256>}]} {
    %c0 = arith.constant 0 : index
    %c0_0 = arith.constant 0 : index
    %c0_1 = arith.constant 0 : index
    %0 = vector.load %arg2[%c0, %c0_0, %c0_1] : memref<1x4x256xbf16, #tpu.memory_space<vmem>>, vector<1x4x256xbf16>
    %1 = vector.shape_cast %0 : vector<1x4x256xbf16> to vector<4x256xbf16>
    %c0_2 = arith.constant 0 : index
    %c0_3 = arith.constant 0 : index
    %2 = vector.load %arg3[%c0_2, %c0_3] : memref<32x4xbf16, #tpu.memory_space<vmem>>, vector<32x4xbf16>
    %cst = arith.constant dense<0.000000e+00> : vector<32x256xf32>
    %3 = tpu.matmul %2, %1, %cst {dimension_numbers = #tpu.dot_dimension_numbers<[1], [0], [0], [1], [0, 0, 1, 1], [], []>} : vector<32x4xbf16>, vector<4x256xbf16>, vector<32x256xf32> -> vector<32x256xf32>
    %c0_4 = arith.constant 0 : index
    %c0_5 = arith.constant 0 : index
    %4 = vector.load %arg4[%c0_4, %c0_5] : memref<32x1xf32, #tpu.memory_space<vmem>>, vector<32x1xf32>
    %5 = vector.broadcast %4 : vector<32x1xf32> to vector<32x256xf32>
    %6 = arith.addf %3, %5 : vector<32x256xf32>
    %7 = arith.negf %6 : vector<32x256xf32>
    %8 = math.exp %7 : vector<32x256xf32>
    %cst_6 = arith.constant 1.000000e+00 : f32
    %9 = vector.broadcast %cst_6 : f32 to vector<32x256xf32>
    %10 = arith.addf %9, %8 : vector<32x256xf32>
    %11 = arith.divf %9, %10 : vector<32x256xf32>
    %12 = arith.mulf %6, %11 : vector<32x256xf32>
    %c0_7 = arith.constant 0 : index
    %c0_8 = arith.constant 0 : index
    %13 = vector.load %arg5[%c0_7, %c0_8] : memref<4x32xbf16, #tpu.memory_space<vmem>>, vector<4x32xbf16>
    %14 = arith.truncf %12 : vector<32x256xf32> to vector<32x256xbf16>
    %cst_9 = arith.constant dense<0.000000e+00> : vector<4x256xf32>
    %15 = tpu.matmul %13, %14, %cst_9 {dimension_numbers = #tpu.dot_dimension_numbers<[1], [0], [0], [1], [0, 0, 1, 1], [], []>} : vector<4x32xbf16>, vector<32x256xbf16>, vector<4x256xf32> -> vector<4x256xf32>
    %c0_10 = arith.constant 0 : index
    %c0_11 = arith.constant 0 : index
    %16 = vector.load %arg6[%c0_10, %c0_11] : memref<4x1xf32, #tpu.memory_space<vmem>>, vector<4x1xf32>
    %17 = vector.broadcast %16 : vector<4x1xf32> to vector<4x256xf32>
    %18 = arith.addf %15, %17 : vector<4x256xf32>
    %19 = arith.negf %18 : vector<4x256xf32>
    %20 = math.exp %19 : vector<4x256xf32>
    %cst_12 = arith.constant 1.000000e+00 : f32
    %21 = vector.broadcast %cst_12 : f32 to vector<4x256xf32>
    %22 = arith.addf %21, %20 : vector<4x256xf32>
    %23 = arith.divf %21, %22 : vector<4x256xf32>
    %24 = arith.mulf %18, %23 : vector<4x256xf32>
    %25 = arith.extf %1 : vector<4x256xbf16> to vector<4x256xf32>
    %26 = arith.addf %24, %25 : vector<4x256xf32>
    %27 = arith.truncf %26 : vector<4x256xf32> to vector<4x256xbf16>
    %c0_13 = arith.constant 0 : index
    %c0_14 = arith.constant 0 : index
    %c0_15 = arith.constant 0 : index
    %28 = vector.load %arg7[%c0_13, %c0_14, %c0_15] : memref<1x4x256xbf16, #tpu.memory_space<vmem>>, vector<1x4x256xbf16>
    %29 = vector.shape_cast %28 : vector<1x4x256xbf16> to vector<4x256xbf16>
    %30 = vector.shape_cast %27 : vector<4x256xbf16> to vector<1x4x256xbf16>
    tpu.vector_store %arg7[%c0_13, %c0_14, %c0_15], %30 {strides = array<i32>} : memref<1x4x256xbf16, #tpu.memory_space<vmem>>, vector<1x4x256xbf16>,
    return
  }
  func.func @transform_0(%arg0: i32, %arg1: i32) -> (i32, i32, i32) {
    %c0_i32 = arith.constant 0 : i32
    %c0_i32_0 = arith.constant 0 : i32
    return %arg0, %c0_i32, %arg1 : i32, i32, i32
  }
  func.func @transform_1(%arg0: i32, %arg1: i32) -> (i32, i32) {
    %c0_i32 = arith.constant 0 : i32
    %c0_i32_0 = arith.constant 0 : i32
    %c0_i32_1 = arith.constant 0 : i32
    return %c0_i32, %c0_i32_0 : i32, i32
  }
  func.func @transform_2(%arg0: i32, %arg1: i32) -> (i32, i32) {
    %c0_i32 = arith.constant 0 : i32
    %c0_i32_0 = arith.constant 0 : i32
    %c0_i32_1 = arith.constant 0 : i32
    return %c0_i32, %c0_i32_0 : i32, i32
  }
  func.func @transform_3(%arg0: i32, %arg1: i32) -> (i32, i32) {
    %c0_i32 = arith.constant 0 : i32
    %c0_i32_0 = arith.constant 0 : i32
    %c0_i32_1 = arith.constant 0 : i32
    return %c0_i32, %c0_i32_0 : i32, i32
  }
  func.func @transform_4(%arg0: i32, %arg1: i32) -> (i32, i32) {
    %c0_i32 = arith.constant 0 : i32
    %c0_i32_0 = arith.constant 0 : i32
    %c0_i32_1 = arith.constant 0 : i32
    return %c0_i32, %c0_i32_0 : i32, i32
  }
  func.func @transform_5(%arg0: i32, %arg1: i32) -> (i32, i32, i32) {
    %c0_i32 = arith.constant 0 : i32
    %c0_i32_0 = arith.constant 0 : i32
    return %arg0, %c0_i32, %arg1 : i32, i32, i32
  }
}

</mosaic_0001>

<bundles_post_ra>
// kernel: ecb_forward.1
= control target key start
LH: loop header
LB: loop body
LE: loop exit
PB: predicated region body
PF: predicated region fallthrough
CT: control target
= control target key end

     0   :  { %s770_s18 = smov 0   ;;  %s772_s19 = smov 0   ;;  %s838_s0 = inlined_call_operand.vmem [shape: bf16[2,4,256], index: 0, kind: input, shape index: {}]   ;;  %s839_s1 = inlined_call_operand.vmem [shape: bf16[32,4], index: 1, kind: input, shape index: {}]   ;;  %s840_s2 = inlined_call_operand.vmem [shape: f32[32,1], index: 2, kind: input, shape index: {}]   ;;  %s841_s3 = inlined_call_operand.vmem [shape: bf16[4,32], index: 3, kind: input, shape index: {}]   ;;  %s842_s4 = inlined_call_operand.vmem [shape: f32[4,1], index: 4, kind: input, shape index: {}]   ;;  %s843_s5 = inlined_call_operand.vmem [shape: bf16[2,4,256], index: 5, kind: output, shape index: {}]  }
   0x1   :  { %s774_s20 = smov 0  }
   0x2 LB: > { %s27_s21 = sadd.s32 1, %s732_s19  ;;  %p617_p0 = scmp.ge.s32.totalorder %s736_s20, 1  ;;  %s736_s20 = sphi %s774_s20, %s15_s20   ;;  %s732_s19 = sphi %s772_s19, %s845_s19   ;;  %s728_s18 = sphi %s770_s18, %s844_s18  }
   0x3   : > { %p29_p1 = scmp.ge.s32.totalorder %s27_s21, 2  ;;  %p208_p2 = scmp.lt.s32.totalorder %s736_s20, 3 }
   0x5   : > { %s847_s21 = smov (%p29_p1, %s27_s21), 0  ;;  %p209_p3 = pnand %p617_p0, %p208_p2 }
   0x6   : > { %p245_p4 = scmp.lt.s32.totalorder (!%p209_p3), %s728_s18, 1  ;;  %v308_v0 = vlaneseq (!%p209_p3)  ;;  %v738_v1 = vmov (!%p209_p3), 1983009808   ;;  %v739_v3 = vmov (!%p209_p3), 0   ;;  %v270_v6 = vld [vmem:[%s840_s2] sm:$0xff] (!%p209_p3)  ;;  %v272_v7 = vld [vmem:[%s840_s2 + $0x10] sm:$0xff] (!%p209_p3) }
   0x7   : > { %212 = sbr.rel (%p209_p3) target bundleno = 533 (0x215), region = 40  ;;  %v306_v2 = vunpack.c.l.s4 (!%p209_p3), %v738_v1  ;;  %359 = vmatprep.mubr.bf16.mxu0 (!%p209_p3), %v739_v3  ;;  %670 = vset.pattern.permute.xlu0 (!%p209_p3), %v739_v3  ;;  %v271_v9 = vld [vmem:[%s840_s2 + $0x8] sm:$0xff] (!%p209_p3)  ;;  %v273_v10 = vld [vmem:[%s840_s2 + $0x18] sm:$0xff] (!%p209_p3)  ;;  %vm320_vm0 = vcmask (!%p209_p3), 1041408   ;;  %v441_v15 = vld [vmem:[%s842_s4] sm:$0xf] (!%p209_p3) }
   0x8   : > { %v309_v4 = vshrl.u32 (!%p209_p3), %v308_v0, 7  ;;  %671 = vset.pattern.permute.xlu1 (!%p209_p3), %v739_v3  ;;  %483 = vmatprep.mubr.bf16.mxu1 (!%p209_p3), %v739_v3  ;;  %v672_v16 = vld [vmem:[%s839_s1] sm:$0xff] (!%p209_p3)   ;;  %vm313_vm1 = vcmask (!%p209_p3), 31744   ;;  %v673_v17 = vld [vmem:[%s839_s1 + $0x8] sm:$0xff] (!%p209_p3)   ;;  %vm447_vm2 = vcmask (!%p209_p3), 261120  }
   0x9   : > { %v307_v5 = vunpack.c.0.s8 (!%p209_p3), %v306_v2  ;;  %276 = vperm.xlu0 (!%p209_p3), %670, %v270_v6   ;;  %286 = vperm.xlu1 (!%p209_p3), %671, %v272_v7  }
   0xb   : > { %v310_v8 = vsub.s32 (!%p209_p3), %v307_v5, %v309_v4 }
   0xd   : > { %281 = vperm.xlu0 (!%p209_p3), %670, %v271_v9   ;;  %291 = vperm.xlu1 (!%p209_p3), %671, %v273_v10  }
   0xe   : > { %s849_s18 = smov (!%p245_p4, %s728_s18), 1 }
   0xf   : > { %s642_s26 = sshll.u32 %s849_s18, 2 }
  0x10   : > { %s252_s29 = scalar_lea.vmem %s838_s0, %s642_s26  ;;  %s262_s23 = scalar_lea.vmem %s843_s5, %s642_s26 }
  0x11   : > { %v808_v11 = vld [vmem:[%s252_s29] sm:$0xf]  ;;  %444 = vperm.xlu0 %670, %v441_v15  }
  0x12   : > { %v311_v12 = vrot.slane %v808_v11, %v310_v8 }
  0x14   : > { %v312_v13 = vcombine.high %v311_v12, %v311_v12  ;;  %v322_v14 = vsel %vm320_vm0, %v311_v12, 0 }
  0x16   : > { %624 = vmatprep.subr.msk.bf16.mxu0 %vm320_vm0, %v312_v13 }
  0x17   : > { %328 = vmatpush1.bf16.msra.mxu0 %v322_v14 }
  0x1a   : > { %625 = vmatmul.mubr.msk.bf16.vlgmr.msra.gmra.mrb[0].mxu0 %vm313_vm1, %v672_v16 }
  0x1b   : > { %369 = vmatprep.mubr.bf16.mxu0 %v739_v3 }
  0x22   : > { %626 = vmatmul.mubr.msk.bf16.gmra.mrb[4].mxu0 %vm313_vm1, %v673_v17 }
  0x88   : > { %v277_v18 = vpop.permute.xlu0 %276  ;;  %v287_v29 = vpop.permute.xlu1 %286 }
  0x8c   : > { %v282_v22 = vpop.permute.xlu0 %281  ;;  %v292_v36 = vpop.permute.xlu1 %291 }
  0xed   : > { %v361_v19 = vpop.f32.mrb[0].mxu0 }
  0xee   : > { %v362_v20 = vadd.f32 %v361_v19, %v277_v18  ;;  %v363_v21 = vpop.f32.mrb[1].mxu0  ;;  %v436_v19 = vld [vmem:[%s841_s3] sm:$0x3] }
  0xef   : > { %v364_v23 = vadd.f32 %v363_v21, %v277_v18  ;;  %v365_v24 = vpop.f32.mrb[2].mxu0 }
  0xf0   : > { %v627_v25 = vmul.f32 -1.442695, %v362_v20  ;;  %v366_v26 = vadd.f32 %v365_v24, %v282_v22  ;;  %v367_v27 = vpop.f32.mrb[3].mxu0 }
  0xf1   : > { %v628_v28 = vmul.f32 -1.442695, %v364_v23  ;;  %v368_v30 = vadd.f32 %v367_v27, %v282_v22 }
  0xf2   : > { %674 = vpow2.f32 %v627_v25  ;;  %v629_v31 = vmul.f32 -1.442695, %v366_v26 }
  0xf3   : > { %676 = vpow2.f32 %v628_v28  ;;  %v630_v32 = vmul.f32 -1.442695, %v368_v30 }
  0xf4   : > { %678 = vpow2.f32 %v629_v31 }
  0xf5   : > { %680 = vpow2.f32 %v630_v32  ;;  %v371_v33 = vpop.f32.mrb[4].mxu0 }
  0xf6   : > { %v372_v34 = vadd.f32 %v371_v33, %v287_v29  ;;  %v373_v35 = vpop.f32.mrb[5].mxu0  ;;  %v506_v33 = vunpack.c.l.bf16 %v808_v11 }
  0xf7   : > { %v374_v37 = vadd.f32 %v373_v35, %v287_v29  ;;  %v375_v38 = vpop.f32.mrb[6].mxu0 }
  0xf8   : > { %v631_v39 = vmul.f32 -1.442695, %v372_v34  ;;  %v376_v40 = vadd.f32 %v375_v38, %v292_v36  ;;  %v377_v41 = vpop.f32.mrb[7].mxu0  ;;  %v508_v35 = vcombine.high %v506_v33, %v506_v33 }
  0xf9   : > { %v632_v42 = vmul.f32 -1.442695, %v374_v37  ;;  %v378_v43 = vadd.f32 %v377_v41, %v292_v36 }
  0xfa   : > { %682 = vpow2.f32 %v631_v39  ;;  %v633_v44 = vmul.f32 -1.442695, %v376_v40 }
  0xfb   : > { %684 = vpow2.f32 %v632_v42  ;;  %v634_v45 = vmul.f32 -1.442695, %v378_v43 }
  0xfc   : > { %v675_v46 = vpop.eup %674  ;;  %686 = vpow2.f32 %v633_v44 }
  0xfd   : > { %v677_v47 = vpop.eup %676  ;;  %v404_v48 = vadd.f32 1.0, %v675_v46  ;;  %688 = vpow2.f32 %v634_v45 }
  0xfe   : > { %v679_v49 = vpop.eup %678  ;;  %v405_v50 = vadd.f32 1.0, %v677_v47 }
  0xff   : > { %v681_v51 = vpop.eup %680  ;;  %690 = vrcp.f32 %v404_v48  ;;  %v406_v52 = vadd.f32 1.0, %v679_v49 }
 0x100   : > { %692 = vrcp.f32 %v405_v50  ;;  %v407_v53 = vadd.f32 1.0, %v681_v51 }
 0x101   : > { %694 = vrcp.f32 %v406_v52 }
 0x102   : > { %696 = vrcp.f32 %v407_v53 }
 0x104   : > { %v683_v54 = vpop.eup %682 }
 0x105   : > { %v685_v55 = vpop.eup %684  ;;  %v408_v56 = vadd.f32 1.0, %v683_v54 }
 0x106   : > { %v687_v57 = vpop.eup %686  ;;  %v409_v58 = vadd.f32 1.0, %v685_v55 }
 0x107   : > { %v689_v59 = vpop.eup %688  ;;  %698 = vrcp.f32 %v408_v56  ;;  %v410_v60 = vadd.f32 1.0, %v687_v57 }
 0x108   : > { %700 = vrcp.f32 %v409_v58  ;;  %v411_v61 = vadd.f32 1.0, %v689_v59 }
 0x109   : > { %v691_v62 = vpop.eup %690  ;;  %702 = vrcp.f32 %v410_v60 }
 0x10a   : > { %v693_v63 = vpop.eup %692  ;;  %704 = vrcp.f32 %v411_v61  ;;  %v428_v2 = vmul.f32 %v691_v62, %v362_v20  ;;  %v445_v20 = vpop.permute.xlu0 %444 }
 0x10b   : > { %v695_v0 = vpop.eup %694  ;;  %v429_v4 = vmul.f32 %v693_v63, %v364_v23 }
 0x10c   : > { %v697_v1 = vpop.eup %696  ;;  %v430_v3 = vmul.f32 %v695_v0, %v366_v26 }
 0x10d   : > { %v431_v5 = vmul.f32 %v697_v1, %v368_v30 }
 0x10e   : > { %v437_v6 = vpack.c.bf16 %v430_v3, %v428_v2 }
 0x10f   : > { %v438_v7 = vpack.c.bf16 %v431_v5, %v429_v4 }
 0x111   : > { %v699_v8 = vpop.eup %698  ;;  %451 = vmatprep.subr.bf16.mxu1 %v438_v7 }
 0x112   : > { %v701_v9 = vpop.eup %700  ;;  %452 = vmatpush1.bf16.msra.mxu1 %v437_v6  ;;  %v432_v13 = vmul.f32 %v699_v8, %v372_v34 }
 0x113   : > { %v703_v10 = vpop.eup %702  ;;  %v433_v15 = vmul.f32 %v701_v9, %v374_v37 }
 0x114   : > { %v705_v12 = vpop.eup %704  ;;  %v434_v14 = vmul.f32 %v703_v10, %v376_v40 }
 0x115   : > { %v435_v16 = vmul.f32 %v705_v12, %v378_v43 }
 0x116   : > { %v439_v17 = vpack.c.bf16 %v434_v14, %v432_v13 }
 0x117   : > { %v440_v18 = vpack.c.bf16 %v435_v16, %v433_v15 }
 0x119   : > { %453 = vmatprep.subr.bf16.mxu1 %v440_v18 }
 0x11a   : > { %454 = vmatpush1.bf16.msra.mxu1 %v439_v17 }
 0x11d   : > { %635 = vmatmul.mubr.msk.bf16.vlgmr.msra.gmra.mrb[0].mxu1 %vm447_vm2, %v436_v19 }
 0x1f0   : > { %v485_v21 = vpop.f32.mrb[0].mxu1 }
 0x1f1   : > { %v486_v22 = vadd.f32 %v485_v21, %v445_v20  ;;  %v487_v23 = vpop.f32.mrb[1].mxu1 }
 0x1f2   : > { %v488_v24 = vadd.f32 %v487_v23, %v445_v20  ;;  %v489_v25 = vpop.f32.mrb[2].mxu1 }
 0x1f3   : > { %v636_v26 = vmul.f32 -1.442695, %v486_v22  ;;  %v490_v27 = vpop.f32.mrb[3].mxu1 }
 0x1f4   : > { %v637_v28 = vmul.f32 -1.442695, %v488_v24 }
 0x1f5   : > { %706 = vpow2.f32 %v636_v26 }
 0x1f6   : > { %708 = vpow2.f32 %v637_v28 }
 0x1ff   : > { %v707_v29 = vpop.eup %706 }
 0x200   : > { %v709_v30 = vpop.eup %708  ;;  %v498_v31 = vadd.f32 1.0, %v707_v29 }
 0x201   : > { %v499_v32 = vadd.f32 1.0, %v709_v30 }
 0x202   : > { %710 = vrcp.f32 %v498_v31 }
 0x203   : > { %712 = vrcp.f32 %v499_v32 }
 0x20c   : > { %v711_v34 = vpop.eup %710 }
 0x20d   : > { %v713_v36 = vpop.eup %712  ;;  %v504_v37 = vmul.f32 %v711_v34, %v486_v22 }
 0x20e   : > { %v505_v38 = vmul.f32 %v713_v36, %v488_v24 }
 0x20f   : > { %v510_v39 = vadd.f32 %v506_v33, %v504_v37 }
 0x210   : > { %v511_v40 = vadd.f32 %v508_v35, %v505_v38 }
 0x212   : > { %v638_v41 = vpack.c.bf16 %v511_v40, %v510_v39 }
 0x214   : > { %639 = vst.sshfl [vmem:[%s262_s23] sm:$0x33 pattern:$0x76325410] %v638_v41 }
 0x215 PF: > { %s15_s20 = sadd.s32 1, %s736_s20   ;;  %s844_s18 = smov %s732_s19 }
 0x216   : > { %p12_p5 = scmp.ge.s32.totalorder %s15_s20, 4   ;;  %s845_s19 = smov %s847_s21 }
 0x218   :  { %14 = sbr.rel (!%p12_p5) target bundleno = 2 (0x2), region = 70 }

</bundles_post_ra>
